<compile_context>
chip_gen: v5e
topology: v5e:2x2
jax: 0.10.0
libtpu: 0.0.40
codegen_flags: <defaults>
</compile_context>

<pallas_src>
import jax
import jax.numpy as jnp
import numpy as np
from jax import lax
from jax.experimental import pallas as pl
from jax.experimental.pallas import tpu as pltpu

HIDDEN = 32
EPS = 1e-8
NEG_SLOPE = 0.01  # nn.LeakyReLU default

# packed-slab row offsets (all 8-sublane aligned)
_W1_R0, _W1_R1 = 0, 8        # l1 weight  [6->8, 32]   (rows pre-scaled by 1/3,1/7)
_W2_R0, _W2_R1 = 8, 40       # l2 weight  [32, 32]
_D1_R0, _D1_R1 = 40, 72      # dec.0 weight [32, 32]
_D2_R0, _D2_R1 = 72, 104     # dec.2 weight [32, 6->32] (cols pre-scaled by 3,7)
_B1_R, _B2_R, _DB1_R, _DB2_R = 104, 105, 106, 107
_SLAB_ROWS = 112             # padded to multiple of 8
_SLAB_LANES = 32


def _leaky(x):
    return jnp.where(x >= 0, x, NEG_SLOPE * x)


def bounce_kernel(rc_ref, vw_ref, slab_ref, out_ref):
    vw = vw_ref[...]                           # [TB, 8]
    vx, vy, vz = vw[:, 0:1], vw[:, 1:2], vw[:, 2:3]
    wx0, wy0, wz0 = vw[:, 3:4], vw[:, 4:5], vw[:, 5:6]

    # ---- recode: 3x3 linear as 9 scalar FMAs on the VPU (weights live in SMEM) ----
    wx = rc_ref[0] * wx0 + rc_ref[1] * wy0 + rc_ref[2] * wz0 + rc_ref[9]
    wy = rc_ref[3] * wx0 + rc_ref[4] * wy0 + rc_ref[5] * wz0 + rc_ref[10]
    wz = rc_ref[6] * wx0 + rc_ref[7] * wy0 + rc_ref[8] * wz0 + rc_ref[11]

    # ---- gram_schmidth_2d on (v[:, :2], w[:, :2]) ----
    inv_v = pl.reciprocal(jnp.sqrt(vx * vx + vy * vy) + EPS, approx=False)
    von_x = vx * inv_v
    von_y = vy * inv_v

    proj = wx * von_x + wy * von_y
    wo_x = wx - proj * von_x
    wo_y = wy - proj * von_y
    inv_w = pl.reciprocal(jnp.sqrt(wo_x * wo_x + wo_y * wo_y) + EPS, approx=False)
    won_x = wo_x * inv_w
    won_y = wo_y * inv_w

    det = von_x * won_y - von_y * won_x
    sgn = jnp.where(det < 0.0, -1.0, 1.0)
    won_x = won_x * sgn
    won_y = won_y * sgn

    # local coords: R^T @ [x, y]
    vlx = von_x * vx + von_y * vy
    vly = won_x * vx + won_y * vy
    wlx = von_x * wx + von_y * wy
    wly = won_x * wx + won_y * wy

    # ---- assemble MLP input [TB, 8] in one masked-select pass (1/3, 1/7 folded into W1) ----
    lane8 = lax.broadcasted_iota(jnp.int32, vw.shape, 1)
    x8 = jnp.where(lane8 == 0, vlx,
         jnp.where(lane8 == 1, vly,
         jnp.where(lane8 == 2, vz,
         jnp.where(lane8 == 3, wlx,
         jnp.where(lane8 == 4, wly,
         jnp.where(lane8 == 5, wz, 0.0))))))

    # ---- static views into the packed weight slab ----
    w1 = slab_ref[_W1_R0:_W1_R1, :]            # [8, 32]  (rows 6,7 zero)
    w2 = slab_ref[_W2_R0:_W2_R1, :]            # [32, 32]
    d1w = slab_ref[_D1_R0:_D1_R1, :]           # [32, 32]
    d2w = slab_ref[_D2_R0:_D2_R1, :]           # [32, 32] (cols 6.. zero, scaled)
    b1 = slab_ref[_B1_R:_B1_R + 1, :]          # [1, 32]
    b2 = slab_ref[_B2_R:_B2_R + 1, :]
    db1 = slab_ref[_DB1_R:_DB1_R + 1, :]
    db2 = slab_ref[_DB2_R:_DB2_R + 1, :]       # [1, 32] (lanes 6.. zero, scaled)

    # ---- MLP ----
    h1 = _leaky(jnp.dot(x8, w1, preferred_element_type=jnp.float32) + b1)
    h2 = _leaky(jnp.dot(h1, w2, preferred_element_type=jnp.float32) + b2)
    h = h1 + h2 * h1
    g = _leaky(jnp.dot(h, d1w, preferred_element_type=jnp.float32) + db1)
    y = jnp.dot(g, d2w, preferred_element_type=jnp.float32) + db2     # [TB, 32], lanes 0..5 used

    vlx_n, vly_n, vz_n = y[:, 0:1], y[:, 1:2], y[:, 2:3]   # *3 already folded
    wlx_n, wly_n, wz_n = y[:, 3:4], y[:, 4:5], y[:, 5:6]   # *7 already folded

    # rotate back: R @ [x_local, y_local]
    vnx = von_x * vlx_n + won_x * vly_n
    vny = von_y * vlx_n + won_y * vly_n
    wnx = von_x * wlx_n + won_x * wly_n
    wny = von_y * wlx_n + won_y * wly_n

    out_ref[...] = jnp.where(lane8 == 0, vnx,
                   jnp.where(lane8 == 1, vny,
                   jnp.where(lane8 == 2, vz_n,
                   jnp.where(lane8 == 3, wnx,
                   jnp.where(lane8 == 4, wny,
                   jnp.where(lane8 == 5, wz_n, 0.0))))))


# --------------------------- parameter prep ---------------------------
def make_params(key):
    """Deterministic synthetic parameters (PyTorch nn.Linear-style uniform init)."""
    def linear(key, fan_in, fan_out):
        k1, k2 = jax.random.split(key)
        bound = 1.0 / np.sqrt(fan_in)
        W = jax.random.uniform(k1, (fan_out, fan_in), jnp.float32, -bound, bound)
        b = jax.random.uniform(k2, (fan_out,), jnp.float32, -bound, bound)
        return W, b

    keys = jax.random.split(key, 5)
    rc_W, rc_b = linear(keys[0], 3, 3)
    l1_W, l1_b = linear(keys[1], 6, HIDDEN)
    l2_W, l2_b = linear(keys[2], HIDDEN, HIDDEN)
    d1_W, d1_b = linear(keys[3], HIDDEN, HIDDEN)
    d2_W, d2_b = linear(keys[4], HIDDEN, 6)
    return dict(rc_W=rc_W, rc_b=rc_b, l1_W=l1_W, l1_b=l1_b,
                l2_W=l2_W, l2_b=l2_b, d1_W=d1_W, d1_b=d1_b,
                d2_W=d2_W, d2_b=d2_b)


def pack_params(params):
    """Fold constant scales into weights and pack everything into one slab + recode scalars."""
    s_in = jnp.array([1 / 3.] * 3 + [1 / 7.] * 3, jnp.float32)    # input normalization
    s_out = jnp.array([3.] * 3 + [7.] * 3, jnp.float32)           # output de-normalization

    W1 = params["l1_W"].T * s_in[:, None]        # [6, 32], rows scaled
    W2 = params["l2_W"].T                        # [32, 32]
    D1 = params["d1_W"].T                        # [32, 32]
    D2 = params["d2_W"].T * s_out[None, :]       # [32, 6], cols scaled
    db2 = params["d2_b"] * s_out                 # [6]

    slab = jnp.zeros((_SLAB_ROWS, _SLAB_LANES), jnp.float32)
    slab = slab.at[_W1_R0:_W1_R0 + 6, :].set(W1)
    slab = slab.at[_W2_R0:_W2_R1, :].set(W2)
    slab = slab.at[_D1_R0:_D1_R1, :].set(D1)
    slab = slab.at[_D2_R0:_D2_R1, 0:6].set(D2)
    slab = slab.at[_B1_R, :].set(params["l1_b"])
    slab = slab.at[_B2_R, :].set(params["l2_b"])
    slab = slab.at[_DB1_R, :].set(params["d1_b"])
    slab = slab.at[_DB2_R, 0:6].set(db2)

    rc = jnp.concatenate([params["rc_W"].reshape(-1),
                          params["rc_b"]]).astype(jnp.float32)     # [12] row-major W, then b
    return rc, slab


def _round_up(x, m):
    return ((x + m - 1) // m) * m


# --------------------------- wrapper ---------------------------
def bounce_forward(v, w, rc, slab, *, tb_max=512):
    """v, w: [B, 3] or [B, 1, 3] float32. Returns (v_new, w_new) in the same shape."""
    shapes = v.shape
    B = shapes[0]
    v2 = v.reshape(B, 3).astype(jnp.float32)
    w2 = w.reshape(B, 3).astype(jnp.float32)
    vw = jnp.concatenate([v2, w2, jnp.zeros((B, 2), jnp.float32)], axis=-1)   # [B, 8]

    tb = min(_round_up(B, 8), tb_max)
    b_pad = _round_up(B, tb)
    if b_pad != B:
        vw = jnp.pad(vw, ((0, b_pad - B), (0, 0)))
    grid = (b_pad // tb,)

    out = pl.pallas_call(
        bounce_kernel,
        out_shape=jax.ShapeDtypeStruct((b_pad, 8), jnp.float32),
        grid=grid,
        in_specs=[
            pl.BlockSpec(memory_space=pltpu.MemorySpace.SMEM),     # rc scalars
            pl.BlockSpec((tb, 8), lambda i: (i, 0)),               # packed v/w
            pl.BlockSpec((_SLAB_ROWS, _SLAB_LANES), lambda i: (0, 0)),  # weight slab (fetched once)
        ],
        out_specs=pl.BlockSpec((tb, 8), lambda i: (i, 0)),
        compiler_params=pltpu.CompilerParams(
            dimension_semantics=("parallel",)),
    )(rc, vw, slab)

    v_new = out[:B, 0:3].reshape(shapes)
    w_new = out[:B, 3:6].reshape(shapes)
    return v_new, w_new


# ---------------- pure-JAX reference (for validation only) ----------------
def _ref_forward(v, w, p):
    shapes = v.shape
    B = shapes[0]
    v = v.reshape(B, 3)
    w = w.reshape(B, 3)
    w = w @ p["rc_W"].T + p["rc_b"]
    v2d, w2d = v[:, :2], w[:, :2]
    von = v2d / (jnp.linalg.norm(v2d, axis=-1, keepdims=True) + EPS)
    proj = jnp.sum(w2d * von, axis=-1, keepdims=True) * von
    wo = w2d - proj
    won = wo / (jnp.linalg.norm(wo, axis=-1, keepdims=True) + EPS)
    R = jnp.stack([von, won], axis=-1)
    det = jnp.linalg.det(R)
    won = jnp.where((det < 0)[:, None], -won, won)
    R = jnp.stack([von, won], axis=-1)
    RT = jnp.swapaxes(R, -1, -2)
    v2l = jnp.einsum("bij,bj->bi", RT, v2d)
    w2l = jnp.einsum("bij,bj->bi", RT, w2d)
    v_local = jnp.concatenate([v2l, v[:, 2:3]], axis=-1)
    w_local = jnp.concatenate([w2l, w[:, 2:3]], axis=-1)
    x = jnp.concatenate([v_local / 3.0, w_local / 7.0], axis=-1)
    h1 = _leaky(x @ p["l1_W"].T + p["l1_b"])
    h2 = _leaky(h1 @ p["l2_W"].T + p["l2_b"])
    h = h1 + h2 * h1
    d1 = _leaky(h @ p["d1_W"].T + p["d1_b"])
    y = d1 @ p["d2_W"].T + p["d2_b"]
    v2n = jnp.einsum("bij,bj->bi", R, y[:, :2] * 3.0)
    w2n = jnp.einsum("bij,bj->bi", R, y[:, 3:5] * 7.0)
    v_new = jnp.concatenate([v2n, y[:, 2:3] * 3.0], axis=-1).reshape(shapes)
    w_new = jnp.concatenate([w2n, y[:, 5:6] * 7.0], axis=-1).reshape(shapes)
    return v_new, w_new


if __name__ == "__main__":
    key = jax.random.PRNGKey(0)
    kp, kv, kw = jax.random.split(key, 3)
    params = make_params(kp)
    rc, slab = pack_params(params)

    B = 8
    v = jax.random.normal(kv, (B, 3), jnp.float32)
    w = jax.random.normal(kw, (B, 3), jnp.float32)

    v_new, w_new = bounce_forward(v, w, rc, slab)
    jax.block_until_ready((v_new, w_new))

    v_ref, w_ref = _ref_forward(v, w, params)
    np.testing.assert_allclose(np.asarray(v_new), np.asarray(v_ref), rtol=1e-5, atol=1e-5)
    np.testing.assert_allclose(np.asarray(w_new), np.asarray(w_ref), rtol=1e-5, atol=1e-5)

    print("KERNEL_OK")
</pallas_src>

<mosaic_0001>
module attributes {stable_mosaic.version = 11 : i64} {
  func.func @bounce_kernel(%arg0: i32, %arg1: memref<12xf32, #tpu.memory_space<smem>>, %arg2: memref<8x8xf32, #tpu.memory_space<vmem>>, %arg3: memref<112x32xf32, #tpu.memory_space<vmem>>, %arg4: memref<8x8xf32, #tpu.memory_space<vmem>>) attributes {dimension_semantics = [#tpu.dimension_semantics<parallel>], iteration_bounds = array<i64: 1>, scalar_prefetch = 0 : i64, scratch_operands = 0 : i64, tpu.core_type = #tpu.core_type<tc>, window_params = [{transform_indices = @transform_0, window_bounds = array<i64: 12>}, {transform_indices = @transform_1, window_bounds = array<i64: 8, 8>}, {pipeline_mode = #tpu.pipeline_mode<synchronous>, transform_indices = @transform_2, window_bounds = array<i64: 112, 32>}, {transform_indices = @transform_3, window_bounds = array<i64: 8, 8>}]} {
    %c0 = arith.constant 0 : index
    %c0_0 = arith.constant 0 : index
    %0 = vector.load %arg2[%c0, %c0_0] : memref<8x8xf32, #tpu.memory_space<vmem>>, vector<8x8xf32>
    %1 = vector.extract_strided_slice %0 {offsets = [0, 0], sizes = [8, 1], strides = [1, 1]} : vector<8x8xf32> to vector<8x1xf32>
    %2 = vector.extract_strided_slice %0 {offsets = [0, 1], sizes = [8, 1], strides = [1, 1]} : vector<8x8xf32> to vector<8x1xf32>
    %3 = vector.extract_strided_slice %0 {offsets = [0, 2], sizes = [8, 1], strides = [1, 1]} : vector<8x8xf32> to vector<8x1xf32>
    %4 = vector.extract_strided_slice %0 {offsets = [0, 3], sizes = [8, 1], strides = [1, 1]} : vector<8x8xf32> to vector<8x1xf32>
    %5 = vector.extract_strided_slice %0 {offsets = [0, 4], sizes = [8, 1], strides = [1, 1]} : vector<8x8xf32> to vector<8x1xf32>
    %6 = vector.extract_strided_slice %0 {offsets = [0, 5], sizes = [8, 1], strides = [1, 1]} : vector<8x8xf32> to vector<8x1xf32>
    %c0_1 = arith.constant 0 : index
    %7 = memref.load %arg1[%c0_1] : memref<12xf32, #tpu.memory_space<smem>>
    %8 = vector.broadcast %7 : f32 to vector<8x1xf32>
    %9 = arith.mulf %8, %4 : vector<8x1xf32>
    %c1 = arith.constant 1 : index
    %10 = memref.load %arg1[%c1] : memref<12xf32, #tpu.memory_space<smem>>
    %11 = vector.broadcast %10 : f32 to vector<8x1xf32>
    %12 = arith.mulf %11, %5 : vector<8x1xf32>
    %13 = arith.addf %9, %12 : vector<8x1xf32>
    %c2 = arith.constant 2 : index
    %14 = memref.load %arg1[%c2] : memref<12xf32, #tpu.memory_space<smem>>
    %15 = vector.broadcast %14 : f32 to vector<8x1xf32>
    %16 = arith.mulf %15, %6 : vector<8x1xf32>
    %17 = arith.addf %13, %16 : vector<8x1xf32>
    %c9 = arith.constant 9 : index
    %18 = memref.load %arg1[%c9] : memref<12xf32, #tpu.memory_space<smem>>
    %19 = vector.broadcast %18 : f32 to vector<8x1xf32>
    %20 = arith.addf %17, %19 : vector<8x1xf32>
    %c3 = arith.constant 3 : index
    %21 = memref.load %arg1[%c3] : memref<12xf32, #tpu.memory_space<smem>>
    %22 = vector.broadcast %21 : f32 to vector<8x1xf32>
    %23 = arith.mulf %22, %4 : vector<8x1xf32>
    %c4 = arith.constant 4 : index
    %24 = memref.load %arg1[%c4] : memref<12xf32, #tpu.memory_space<smem>>
    %25 = vector.broadcast %24 : f32 to vector<8x1xf32>
    %26 = arith.mulf %25, %5 : vector<8x1xf32>
    %27 = arith.addf %23, %26 : vector<8x1xf32>
    %c5 = arith.constant 5 : index
    %28 = memref.load %arg1[%c5] : memref<12xf32, #tpu.memory_space<smem>>
    %29 = vector.broadcast %28 : f32 to vector<8x1xf32>
    %30 = arith.mulf %29, %6 : vector<8x1xf32>
    %31 = arith.addf %27, %30 : vector<8x1xf32>
    %c10 = arith.constant 10 : index
    %32 = memref.load %arg1[%c10] : memref<12xf32, #tpu.memory_space<smem>>
    %33 = vector.broadcast %32 : f32 to vector<8x1xf32>
    %34 = arith.addf %31, %33 : vector<8x1xf32>
    %c6 = arith.constant 6 : index
    %35 = memref.load %arg1[%c6] : memref<12xf32, #tpu.memory_space<smem>>
    %36 = vector.broadcast %35 : f32 to vector<8x1xf32>
    %37 = arith.mulf %36, %4 : vector<8x1xf32>
    %c7 = arith.constant 7 : index
    %38 = memref.load %arg1[%c7] : memref<12xf32, #tpu.memory_space<smem>>
    %39 = vector.broadcast %38 : f32 to vector<8x1xf32>
    %40 = arith.mulf %39, %5 : vector<8x1xf32>
    %41 = arith.addf %37, %40 : vector<8x1xf32>
    %c8 = arith.constant 8 : index
    %42 = memref.load %arg1[%c8] : memref<12xf32, #tpu.memory_space<smem>>
    %43 = vector.broadcast %42 : f32 to vector<8x1xf32>
    %44 = arith.mulf %43, %6 : vector<8x1xf32>
    %45 = arith.addf %41, %44 : vector<8x1xf32>
    %c11 = arith.constant 11 : index
    %46 = memref.load %arg1[%c11] : memref<12xf32, #tpu.memory_space<smem>>
    %47 = vector.broadcast %46 : f32 to vector<8x1xf32>
    %48 = arith.addf %45, %47 : vector<8x1xf32>
    %49 = arith.mulf %1, %1 : vector<8x1xf32>
    %50 = arith.mulf %2, %2 : vector<8x1xf32>
    %51 = arith.addf %49, %50 : vector<8x1xf32>
    %52 = math.sqrt %51 : vector<8x1xf32>
    %cst = arith.constant 9.99999993E-9 : f32
    %53 = vector.broadcast %cst : f32 to vector<8x1xf32>
    %54 = arith.addf %52, %53 : vector<8x1xf32>
    %55 = tpu.reciprocal %54 : vector<8x1xf32> -> vector<8x1xf32>
    %56 = arith.mulf %1, %55 : vector<8x1xf32>
    %57 = arith.mulf %2, %55 : vector<8x1xf32>
    %58 = arith.mulf %20, %56 : vector<8x1xf32>
    %59 = arith.mulf %34, %57 : vector<8x1xf32>
    %60 = arith.addf %58, %59 : vector<8x1xf32>
    %61 = arith.mulf %60, %56 : vector<8x1xf32>
    %62 = arith.subf %20, %61 : vector<8x1xf32>
    %63 = arith.mulf %60, %57 : vector<8x1xf32>
    %64 = arith.subf %34, %63 : vector<8x1xf32>
    %65 = arith.mulf %62, %62 : vector<8x1xf32>
    %66 = arith.mulf %64, %64 : vector<8x1xf32>
    %67 = arith.addf %65, %66 : vector<8x1xf32>
    %68 = math.sqrt %67 : vector<8x1xf32>
    %cst_2 = arith.constant 9.99999993E-9 : f32
    %69 = vector.broadcast %cst_2 : f32 to vector<8x1xf32>
    %70 = arith.addf %68, %69 : vector<8x1xf32>
    %71 = tpu.reciprocal %70 : vector<8x1xf32> -> vector<8x1xf32>
    %72 = arith.mulf %62, %71 : vector<8x1xf32>
    %73 = arith.mulf %64, %71 : vector<8x1xf32>
    %74 = arith.mulf %56, %73 : vector<8x1xf32>
    %75 = arith.mulf %57, %72 : vector<8x1xf32>
    %76 = arith.subf %74, %75 : vector<8x1xf32>
    %cst_3 = arith.constant 0.000000e+00 : f32
    %77 = vector.broadcast %cst_3 : f32 to vector<8x1xf32>
    %78 = arith.cmpf olt, %76, %77 : vector<8x1xf32>
    %cst_4 = arith.constant -1.000000e+00 : f32
    %cst_5 = arith.constant 1.000000e+00 : f32
    %79 = vector.broadcast %cst_4 : f32 to vector<8x1xf32>
    %80 = vector.broadcast %cst_5 : f32 to vector<8x1xf32>
    %81 = arith.select %78, %79, %80 : vector<8x1xi1>, vector<8x1xf32>
    %82 = arith.mulf %72, %81 : vector<8x1xf32>
    %83 = arith.mulf %73, %81 : vector<8x1xf32>
    %84 = arith.mulf %56, %1 : vector<8x1xf32>
    %85 = arith.mulf %57, %2 : vector<8x1xf32>
    %86 = arith.addf %84, %85 : vector<8x1xf32>
    %87 = arith.mulf %82, %1 : vector<8x1xf32>
    %88 = arith.mulf %83, %2 : vector<8x1xf32>
    %89 = arith.addf %87, %88 : vector<8x1xf32>
    %90 = arith.mulf %56, %20 : vector<8x1xf32>
    %91 = arith.mulf %57, %34 : vector<8x1xf32>
    %92 = arith.addf %90, %91 : vector<8x1xf32>
    %93 = arith.mulf %82, %20 : vector<8x1xf32>
    %94 = arith.mulf %83, %34 : vector<8x1xf32>
    %95 = arith.addf %93, %94 : vector<8x1xf32>
    %96 = tpu.iota {dimensions = array<i32: 1>} : vector<8x8xi32>
    %c0_i32 = arith.constant 0 : i32
    %97 = vector.broadcast %c0_i32 : i32 to vector<8x8xi32>
    %98 = arith.cmpi eq, %96, %97 : vector<8x8xi32>
    %c1_i32 = arith.constant 1 : i32
    %99 = vector.broadcast %c1_i32 : i32 to vector<8x8xi32>
    %100 = arith.cmpi eq, %96, %99 : vector<8x8xi32>
    %c2_i32 = arith.constant 2 : i32
    %101 = vector.broadcast %c2_i32 : i32 to vector<8x8xi32>
    %102 = arith.cmpi eq, %96, %101 : vector<8x8xi32>
    %c3_i32 = arith.constant 3 : i32
    %103 = vector.broadcast %c3_i32 : i32 to vector<8x8xi32>
    %104 = arith.cmpi eq, %96, %103 : vector<8x8xi32>
    %c4_i32 = arith.constant 4 : i32
    %105 = vector.broadcast %c4_i32 : i32 to vector<8x8xi32>
    %106 = arith.cmpi eq, %96, %105 : vector<8x8xi32>
    %c5_i32 = arith.constant 5 : i32
    %107 = vector.broadcast %c5_i32 : i32 to vector<8x8xi32>
    %108 = arith.cmpi eq, %96, %107 : vector<8x8xi32>
    %cst_6 = arith.constant 0.000000e+00 : f32
    %109 = vector.shape_cast %48 : vector<8x1xf32> to vector<8x1xf32>
    %110 = vector.broadcast %109 : vector<8x1xf32> to vector<8x8xf32>
    %111 = vector.broadcast %cst_6 : f32 to vector<8x8xf32>
    %112 = arith.select %108, %110, %111 : vector<8x8xi1>, vector<8x8xf32>
    %113 = vector.shape_cast %95 : vector<8x1xf32> to vector<8x1xf32>
    %114 = vector.broadcast %113 : vector<8x1xf32> to vector<8x8xf32>
    %115 = arith.select %106, %114, %112 : vector<8x8xi1>, vector<8x8xf32>
    %116 = vector.shape_cast %92 : vector<8x1xf32> to vector<8x1xf32>
    %117 = vector.broadcast %116 : vector<8x1xf32> to vector<8x8xf32>
    %118 = arith.select %104, %117, %115 : vector<8x8xi1>, vector<8x8xf32>
    %119 = vector.shape_cast %3 : vector<8x1xf32> to vector<8x1xf32>
    %120 = vector.broadcast %119 : vector<8x1xf32> to vector<8x8xf32>
    %121 = arith.select %102, %120, %118 : vector<8x8xi1>, vector<8x8xf32>
    %122 = vector.shape_cast %89 : vector<8x1xf32> to vector<8x1xf32>
    %123 = vector.broadcast %122 : vector<8x1xf32> to vector<8x8xf32>
    %124 = arith.select %100, %123, %121 : vector<8x8xi1>, vector<8x8xf32>
    %125 = vector.shape_cast %86 : vector<8x1xf32> to vector<8x1xf32>
    %126 = vector.broadcast %125 : vector<8x1xf32> to vector<8x8xf32>
    %127 = arith.select %98, %126, %124 : vector<8x8xi1>, vector<8x8xf32>
    %c0_7 = arith.constant 0 : index
    %c0_8 = arith.constant 0 : index
    %128 = vector.load %arg3[%c0_7, %c0_8] : memref<112x32xf32, #tpu.memory_space<vmem>>, vector<8x32xf32>
    %c8_9 = arith.constant 8 : index
    %c0_10 = arith.constant 0 : index
    %129 = vector.load %arg3[%c8_9, %c0_10] : memref<112x32xf32, #tpu.memory_space<vmem>>, vector<32x32xf32>
    %c40 = arith.constant 40 : index
    %c0_11 = arith.constant 0 : index
    %130 = vector.load %arg3[%c40, %c0_11] : memref<112x32xf32, #tpu.memory_space<vmem>>, vector<32x32xf32>
    %c72 = arith.constant 72 : index
    %c0_12 = arith.constant 0 : index
    %131 = vector.load %arg3[%c72, %c0_12] : memref<112x32xf32, #tpu.memory_space<vmem>>, vector<32x32xf32>
    %c104 = arith.constant 104 : index
    %c0_13 = arith.constant 0 : index
    %132 = vector.load %arg3[%c104, %c0_13] : memref<112x32xf32, #tpu.memory_space<vmem>>, vector<1x32xf32>
    %c105 = arith.constant 105 : index
    %c0_14 = arith.constant 0 : index
    %133 = vector.load %arg3[%c105, %c0_14] : memref<112x32xf32, #tpu.memory_space<vmem>>, vector<1x32xf32>
    %c106 = arith.constant 106 : index
    %c0_15 = arith.constant 0 : index
    %134 = vector.load %arg3[%c106, %c0_15] : memref<112x32xf32, #tpu.memory_space<vmem>>, vector<1x32xf32>
    %c107 = arith.constant 107 : index
    %c0_16 = arith.constant 0 : index
    %135 = vector.load %arg3[%c107, %c0_16] : memref<112x32xf32, #tpu.memory_space<vmem>>, vector<1x32xf32>
    %cst_17 = arith.constant dense<0.000000e+00> : vector<8x32xf32>
    %136 = tpu.matmul %127, %128, %cst_17 {dimension_numbers = #tpu.dot_dimension_numbers<[1], [0], [0], [1], [0, 0, 1, 1], [], []>} : vector<8x8xf32>, vector<8x32xf32>, vector<8x32xf32> -> vector<8x32xf32>
    %137 = vector.broadcast %132 : vector<1x32xf32> to vector<8x32xf32>
    %138 = arith.addf %136, %137 : vector<8x32xf32>
    %cst_18 = arith.constant 0.000000e+00 : f32
    %139 = vector.broadcast %cst_18 : f32 to vector<8x32xf32>
    %140 = arith.cmpf oge, %138, %139 : vector<8x32xf32>
    %cst_19 = arith.constant 0.00999999977 : f32
    %141 = vector.broadcast %cst_19 : f32 to vector<8x32xf32>
    %142 = arith.mulf %141, %138 : vector<8x32xf32>
    %143 = arith.select %140, %138, %142 : vector<8x32xi1>, vector<8x32xf32>
    %cst_20 = arith.constant dense<0.000000e+00> : vector<8x32xf32>
    %144 = tpu.matmul %143, %129, %cst_20 {dimension_numbers = #tpu.dot_dimension_numbers<[1], [0], [0], [1], [0, 0, 1, 1], [], []>} : vector<8x32xf32>, vector<32x32xf32>, vector<8x32xf32> -> vector<8x32xf32>
    %145 = vector.broadcast %133 : vector<1x32xf32> to vector<8x32xf32>
    %146 = arith.addf %144, %145 : vector<8x32xf32>
    %cst_21 = arith.constant 0.000000e+00 : f32
    %147 = vector.broadcast %cst_21 : f32 to vector<8x32xf32>
    %148 = arith.cmpf oge, %146, %147 : vector<8x32xf32>
    %cst_22 = arith.constant 0.00999999977 : f32
    %149 = vector.broadcast %cst_22 : f32 to vector<8x32xf32>
    %150 = arith.mulf %149, %146 : vector<8x32xf32>
    %151 = arith.select %148, %146, %150 : vector<8x32xi1>, vector<8x32xf32>
    %152 = arith.mulf %151, %143 : vector<8x32xf32>
    %153 = arith.addf %143, %152 : vector<8x32xf32>
    %cst_23 = arith.constant dense<0.000000e+00> : vector<8x32xf32>
    %154 = tpu.matmul %153, %130, %cst_23 {dimension_numbers = #tpu.dot_dimension_numbers<[1], [0], [0], [1], [0, 0, 1, 1], [], []>} : vector<8x32xf32>, vector<32x32xf32>, vector<8x32xf32> -> vector<8x32xf32>
    %155 = vector.broadcast %134 : vector<1x32xf32> to vector<8x32xf32>
    %156 = arith.addf %154, %155 : vector<8x32xf32>
    %cst_24 = arith.constant 0.000000e+00 : f32
    %157 = vector.broadcast %cst_24 : f32 to vector<8x32xf32>
    %158 = arith.cmpf oge, %156, %157 : vector<8x32xf32>
    %cst_25 = arith.constant 0.00999999977 : f32
    %159 = vector.broadcast %cst_25 : f32 to vector<8x32xf32>
    %160 = arith.mulf %159, %156 : vector<8x32xf32>
    %161 = arith.select %158, %156, %160 : vector<8x32xi1>, vector<8x32xf32>
    %cst_26 = arith.constant dense<0.000000e+00> : vector<8x32xf32>
    %162 = tpu.matmul %161, %131, %cst_26 {dimension_numbers = #tpu.dot_dimension_numbers<[1], [0], [0], [1], [0, 0, 1, 1], [], []>} : vector<8x32xf32>, vector<32x32xf32>, vector<8x32xf32> -> vector<8x32xf32>
    %163 = vector.broadcast %135 : vector<1x32xf32> to vector<8x32xf32>
    %164 = arith.addf %162, %163 : vector<8x32xf32>
    %165 = vector.extract_strided_slice %164 {offsets = [0, 0], sizes = [8, 1], strides = [1, 1]} : vector<8x32xf32> to vector<8x1xf32>
    %166 = vector.extract_strided_slice %164 {offsets = [0, 1], sizes = [8, 1], strides = [1, 1]} : vector<8x32xf32> to vector<8x1xf32>
    %167 = vector.extract_strided_slice %164 {offsets = [0, 2], sizes = [8, 1], strides = [1, 1]} : vector<8x32xf32> to vector<8x1xf32>
    %168 = vector.extract_strided_slice %164 {offsets = [0, 3], sizes = [8, 1], strides = [1, 1]} : vector<8x32xf32> to vector<8x1xf32>
    %169 = vector.extract_strided_slice %164 {offsets = [0, 4], sizes = [8, 1], strides = [1, 1]} : vector<8x32xf32> to vector<8x1xf32>
    %170 = vector.extract_strided_slice %164 {offsets = [0, 5], sizes = [8, 1], strides = [1, 1]} : vector<8x32xf32> to vector<8x1xf32>
    %171 = arith.mulf %56, %165 : vector<8x1xf32>
    %172 = arith.mulf %82, %166 : vector<8x1xf32>
    %173 = arith.addf %171, %172 : vector<8x1xf32>
    %174 = arith.mulf %57, %165 : vector<8x1xf32>
    %175 = arith.mulf %83, %166 : vector<8x1xf32>
    %176 = arith.addf %174, %175 : vector<8x1xf32>
    %177 = arith.mulf %56, %168 : vector<8x1xf32>
    %178 = arith.mulf %82, %169 : vector<8x1xf32>
    %179 = arith.addf %177, %178 : vector<8x1xf32>
    %180 = arith.mulf %57, %168 : vector<8x1xf32>
    %181 = arith.mulf %83, %169 : vector<8x1xf32>
    %182 = arith.addf %180, %181 : vector<8x1xf32>
    %c0_i32_27 = arith.constant 0 : i32
    %183 = vector.broadcast %c0_i32_27 : i32 to vector<8x8xi32>
    %184 = arith.cmpi eq, %96, %183 : vector<8x8xi32>
    %c1_i32_28 = arith.constant 1 : i32
    %185 = vector.broadcast %c1_i32_28 : i32 to vector<8x8xi32>
    %186 = arith.cmpi eq, %96, %185 : vector<8x8xi32>
    %c2_i32_29 = arith.constant 2 : i32
    %187 = vector.broadcast %c2_i32_29 : i32 to vector<8x8xi32>
    %188 = arith.cmpi eq, %96, %187 : vector<8x8xi32>
    %c3_i32_30 = arith.constant 3 : i32
    %189 = vector.broadcast %c3_i32_30 : i32 to vector<8x8xi32>
    %190 = arith.cmpi eq, %96, %189 : vector<8x8xi32>
    %c4_i32_31 = arith.constant 4 : i32
    %191 = vector.broadcast %c4_i32_31 : i32 to vector<8x8xi32>
    %192 = arith.cmpi eq, %96, %191 : vector<8x8xi32>
    %c5_i32_32 = arith.constant 5 : i32
    %193 = vector.broadcast %c5_i32_32 : i32 to vector<8x8xi32>
    %194 = arith.cmpi eq, %96, %193 : vector<8x8xi32>
    %cst_33 = arith.constant 0.000000e+00 : f32
    %195 = vector.shape_cast %170 : vector<8x1xf32> to vector<8x1xf32>
    %196 = vector.broadcast %195 : vector<8x1xf32> to vector<8x8xf32>
    %197 = vector.broadcast %cst_33 : f32 to vector<8x8xf32>
    %198 = arith.select %194, %196, %197 : vector<8x8xi1>, vector<8x8xf32>
    %199 = vector.shape_cast %182 : vector<8x1xf32> to vector<8x1xf32>
    %200 = vector.broadcast %199 : vector<8x1xf32> to vector<8x8xf32>
    %201 = arith.select %192, %200, %198 : vector<8x8xi1>, vector<8x8xf32>
    %202 = vector.shape_cast %179 : vector<8x1xf32> to vector<8x1xf32>
    %203 = vector.broadcast %202 : vector<8x1xf32> to vector<8x8xf32>
    %204 = arith.select %190, %203, %201 : vector<8x8xi1>, vector<8x8xf32>
    %205 = vector.shape_cast %167 : vector<8x1xf32> to vector<8x1xf32>
    %206 = vector.broadcast %205 : vector<8x1xf32> to vector<8x8xf32>
    %207 = arith.select %188, %206, %204 : vector<8x8xi1>, vector<8x8xf32>
    %208 = vector.shape_cast %176 : vector<8x1xf32> to vector<8x1xf32>
    %209 = vector.broadcast %208 : vector<8x1xf32> to vector<8x8xf32>
    %210 = arith.select %186, %209, %207 : vector<8x8xi1>, vector<8x8xf32>
    %211 = vector.shape_cast %173 : vector<8x1xf32> to vector<8x1xf32>
    %212 = vector.broadcast %211 : vector<8x1xf32> to vector<8x8xf32>
    %213 = arith.select %184, %212, %210 : vector<8x8xi1>, vector<8x8xf32>
    %c0_34 = arith.constant 0 : index
    %c0_35 = arith.constant 0 : index
    %214 = vector.load %arg4[%c0_34, %c0_35] : memref<8x8xf32, #tpu.memory_space<vmem>>, vector<8x8xf32>
    tpu.vector_store %arg4[%c0_34, %c0_35], %213 {strides = array<i32>} : memref<8x8xf32, #tpu.memory_space<vmem>>, vector<8x8xf32>,
    return
  }
  func.func @transform_0(%arg0: i32) -> i32 {
    %c0_i32 = arith.constant 0 : i32
    %c0_i32_0 = arith.constant 0 : i32
    return %c0_i32 : i32
  }
  func.func @transform_1(%arg0: i32) -> (i32, i32) {
    %c0_i32 = arith.constant 0 : i32
    %c0_i32_0 = arith.constant 0 : i32
    return %arg0, %c0_i32 : i32, i32
  }
  func.func @transform_2(%arg0: i32) -> (i32, i32) {
    %c0_i32 = arith.constant 0 : i32
    %c0_i32_0 = arith.constant 0 : i32
    %c0_i32_1 = arith.constant 0 : i32
    return %c0_i32, %c0_i32_0 : i32, i32
  }
  func.func @transform_3(%arg0: i32) -> (i32, i32) {
    %c0_i32 = arith.constant 0 : i32
    %c0_i32_0 = arith.constant 0 : i32
    return %arg0, %c0_i32 : i32, i32
  }
}

</mosaic_0001>

<bundles_post_ra>
// kernel: tpu_custom_call.1
= control target key start
LH: loop header
LB: loop body
LE: loop exit
PB: predicated region body
PF: predicated region fallthrough
CT: control target
= control target key end

     0   :  { %8 = vsyncpa [#allocation4], 0  ;;  %s797_s0 = inlined_call_operand.vmem [shape: f32[12], index: 0, kind: input, shape index: {}]   ;;  %s798_s1 = inlined_call_operand.vmem [shape: f32[8,8], index: 1, kind: input, shape index: {}]   ;;  %s799_s2 = inlined_call_operand.vmem [shape: f32[112,32], index: 2, kind: input, shape index: {}]   ;;  %s800_s3 = inlined_call_operand.hbm [shape: f32[8,8], index: 3, kind: output, shape index: {}]  }
   0x1   :  { %9 = vsyncpa [#allocation3], 0  ;;  %s15_s14 = sshll.u32 %s797_s0, 4  ;;  %s580_s15 = smov [#allocation2]   ;;  %s16_s14 = int_to_ptr.vmem [resolvable:$true] %s15_s14 }
   0x2   :  { %18 = dma.vmem_to_smem %s16_s14, 16, %s580_s15, [#allocation4]  }
   0x3   :  { %576 = dma.done.wait [#allocation4], 16  }
   0x4   :  { %577 = vsyncadd [#allocation4], 4294967280 }
   0x5   :  { %27 = sfence }
   0x6   :  { %v620_v0 = vld [vmem:[%s798_s1] sm:$0xff]  ;;  %s581_s18 = smov 127   ;;  %s489_s0 = sld [smem:[#allocation2 + $0x1]] }
   0x7   :  { %v95_v1 = vmul.f32 %v620_v0, %v620_v0  ;;  %s490_s19 = sld [smem:[#allocation2 + $0x2]]  ;;  %s582_s1 = smov 126  }
   0x8   :  { %s493_s20 = sld [smem:[#allocation2 + $0x4]]  ;;  %s583_s21 = smov 1  }
   0x9   :  { %97 = vrot.lane.b32.xlu0 %v95_v1, %s581_s18  ;;  %s584_s22 = smov 3   ;;  %s494_s23 = sld [smem:[#allocation2 + $0x5]] }
   0xa   :  { %s585_s24 = smov 2   ;;  %s29_s25 = sld [smem:[#allocation2]] }
   0xb   :  { %s492_s26 = sld [smem:[#allocation2 + $0x3]]  ;;  %s586_s29 = smov 125  }
   0xc   :  { %v33_v6 = vstv %s489_s0  ;;  %s491_s27 = sld [smem:[#allocation2 + $0x9]] }
   0xd   :  { %v34_v7 = vmul.f32 %v33_v6, %v620_v0  ;;  %v41_v12 = vstv %s490_s19  ;;  %s495_s28 = sld [smem:[#allocation2 + $0xa]] }
   0xe   :  { %v55_v13 = vstv %s493_s20  ;;  %v42_v15 = vmul.f32 %v41_v12, %v620_v0  ;;  %s497_s30 = sld [smem:[#allocation2 + $0x7]] }
   0xf   :  { %36 = vrot.lane.b32.xlu1 %v34_v7, %s581_s18  ;;  %v56_v16 = vmul.f32 %v55_v13, %v620_v0  ;;  %v63_v32 = vstv %s494_s23  ;;  %s498_s4 = sld [smem:[#allocation2 + $0x8]] }
  0x10   :  { %44 = vrot.lane.b32.xlu2 %v42_v15, %s582_s1  ;;  %v64_v33 = vmul.f32 %v63_v32, %v620_v0  ;;  %v30_v37 = vstv %s29_s25  ;;  %s496_s5 = sld [smem:[#allocation2 + $0x6]] }
  0x11   :  { %v52_v39 = vstv %s492_s26  ;;  %v31_v40 = vmul.f32 %v30_v37, %v620_v0  ;;  %s499_s6 = sld [smem:[#allocation2 + $0xb]] }
  0x12   :  { %v53_v41 = vmul.f32 %v52_v39, %v620_v0  ;;  %v49_v47 = vstv %s491_s27 }
  0x13   :  { %v71_v49 = vstv %s495_s28 }
  0x17   :  { %58 = vrot.lane.b32.xlu1 %v56_v16, %s581_s18 }
  0x18   :  { %66 = vrot.lane.b32.xlu2 %v64_v33, %s582_s1 }
  0x6a   :  { %v45_v38 = vpop.permute.xlu2 %44 }
  0x72   :  { %v67_v45 = vpop.permute.xlu2 %66 }
  0x7b   :  { %v98_v2 = vpop.permute.xlu0 %97 }
  0x7c   :  { %v100_v3 = vadd.f32 %v98_v2, %v95_v1 }
  0x7e   :  { %532 = vrsqrt.f32 %v100_v3  ;;  %vm108_vm0 = vcmp.eq.f32.partialorder %v100_v3, inf  ;;  %v111_v17 = vand.u32 2147483648, %v100_v3  ;;  %vm110_vm1 = vcmp.eq.f32.partialorder %v100_v3, 0.0 }
  0x81   :  { %v37_v36 = vpop.permute.xlu1 %36 }
  0x82   :  { %v39_v43 = vadd.f32 %v37_v36, %v31_v40 }
  0x84   :  { %v533_v4 = vpop.eup %532  ;;  %v47_v46 = vadd.f32 %v45_v38, %v39_v43 }
  0x85   :  { %v102_v5 = vmul.f32 %v533_v4, %v100_v3 }
  0x86   :  { %v646_v50 = vadd.f32 %v49_v47, %v47_v46 }
  0x87   :  { %v103_v8 = vmul.f32 %v533_v4, %v102_v5 }
  0x89   :  { %v104_v9 = vmul.f32 0.5, %v103_v8  ;;  %v59_v42 = vpop.permute.xlu1 %58 }
  0x8a   :  { %v61_v44 = vadd.f32 %v59_v42, %v53_v41  ;;  %v588_v41 = vmov 1.0  }
  0x8b   :  { %v105_v10 = vsub.f32 1.5, %v104_v9 }
  0x8c   :  { %v69_v48 = vadd.f32 %v67_v45, %v61_v44  ;;  %v93_v44 = vstv %s499_s6 }
  0x8d   :  { %v106_v11 = vmul.f32 %v533_v4, %v105_v10 }
  0x8e   :  { %v648_v52 = vadd.f32 %v71_v49, %v69_v48  ;;  %v589_v48 = vmov 2  }
  0x8f   :  { %v107_v14 = vmul.f32 %v106_v11, %v100_v3 }
  0x91   :  { %v109_v18 = vsel %vm108_vm0, %v100_v3, %v107_v14 }
  0x92   :  { %v112_v19 = vsel %vm110_vm1, %v111_v17, %v109_v18 }
  0x93   :  { %v113_v20 = vadd.f32 1e-08, %v112_v19 }
  0x95   :  { %534 = vrcp.f32 %v113_v20  ;;  %v125_v24 = vand.u32 2147483648, %v113_v20  ;;  %v123_v26 = vand.u32 2147483647, %v113_v20  ;;  %vm119_vm3 = vweird.f32 %v113_v20 }
  0x97   :  { %v126_v28 = vor.u32 1.1754944e-38, %v125_v24  ;;  %vm124_vm5 = vcmp.eq.f32.partialorder %v123_v26, 8.507059e+37  ;;  %v587_v24 = vmov 3  }
  0x98   :  { %520 = vset.pattern.permute.xlu1 %v587_v24  ;;  %518 = vset.pattern.permute.xlu2 %v587_v24 }
  0x99   :  { %519 = vset.pattern.permute.xlu0 %v587_v24  ;;  %v275_v24 = vld [vmem:[%s799_s2 + $0x40] sm:$0xff] }
  0x9a   :  { %358 = vmatpush.msra.mxu2 %v275_v24 }
  0x9b   :  { %v535_v21 = vpop.eup %534 }
  0x9c   :  { %v115_v22 = vmul.f32 %v535_v21, %v113_v20  ;;  %vm120_vm2 = vweird.f32 %v535_v21 }
  0x9d   :  { %vm121_vm4 = vmor %vm119_vm3, %vm120_vm2  ;;  %vm285_vm3 = vcmask 64512  }
  0x9e   :  { %v116_v23 = vsub.f32 1.0, %v115_v22 }
  0xa0   :  { %v117_v25 = vmul.f32 %v535_v21, %v116_v23 }
  0xa2   :  { %v118_v27 = vadd.f32 %v535_v21, %v117_v25  ;;  %v77_v25 = vstv %s497_s30 }
  0xa3   :  { %v78_v26 = vmul.f32 %v77_v25, %v620_v0  ;;  %v274_v25 = vld [vmem:[%s799_s2 + $0x38] sm:$0xff] }
  0xa4   :  { %v122_v29 = vsel %vm121_vm4, %v535_v21, %v118_v27  ;;  %359 = vmatpush.msra.mxu2 %v274_v25 }
  0xa5   :  { %v127_v30 = vsel %vm124_vm5, %v126_v28, %v122_v29  ;;  %v85_v29 = vstv %s498_s4  ;;  %vm313_vm5 = vcmask 261120  }
  0xa6   :  { %130 = vrot.lane.b32.xlu0 %v127_v30, %s583_s21  ;;  %v633_v31 = vmul.f32 %v127_v30, %v620_v0  ;;  %v86_v30 = vmul.f32 %v85_v29, %v620_v0  ;;  %v529_v29 = vld [vmem:[%s799_s2 + $0x69] ss:$0 sm:$0xff] }
  0xae   :  { %135 = vrot.lane.b32.xlu0 %v633_v31, %s584_s22 }
 0x118   :  { %v131_v34 = vpop.permute.xlu0 %130 }
 0x119   :  { %v640_v35 = vmul.f32 %v131_v34, %v620_v0  ;;  %v74_v34 = vstv %s496_s5 }
 0x11a   :  { %v75_v39 = vmul.f32 %v74_v34, %v620_v0 }
 0x11b   :  { %140 = vrot.lane.b32.xlu1 %v640_v35, %s585_s24  ;;  %v205_v32 = vmul.f32 %v640_v35, %v620_v0 }
 0x120   :  { %v136_v51 = vpop.permute.xlu0 %135 }
 0x121   :  { %v138_v54 = vmul.f32 %v136_v51, %v646_v50 }
 0x18d   :  { %v141_v53 = vpop.permute.xlu1 %140 }
 0x18e   :  { %v143_v55 = vmul.f32 %v141_v53, %v648_v52 }
 0x190   :  { %v144_v56 = vadd.f32 %v143_v55, %v138_v54  ;;  %v590_v54 = vmov 0  }
 0x192   :  { %v145_v57 = vmul.f32 %v144_v56, %v136_v51  ;;  %v147_v58 = vmul.f32 %v144_v56, %v141_v53  ;;  %v204_v51 = vmul.f32 %v633_v31, %v620_v0 }
 0x194   :  { %v146_v59 = vsub.f32 %v646_v50, %v145_v57  ;;  %v148_v60 = vsub.f32 %v648_v52, %v147_v58 }
 0x196   :  { %v149_v61 = vmul.f32 %v146_v59, %v146_v59  ;;  %v150_v62 = vmul.f32 %v148_v60, %v148_v60 }
 0x198   :  { %v151_v63 = vadd.f32 %v150_v62, %v149_v61 }
 0x19a   :  { %536 = vrsqrt.f32 %v151_v63  ;;  %vm159_vm6 = vcmp.eq.f32.partialorder %v151_v63, inf  ;;  %v162_v8 = vand.u32 2147483648, %v151_v63  ;;  %vm161_vm7 = vcmp.eq.f32.partialorder %v151_v63, 0.0 }
 0x1a0   :  { %v537_v1 = vpop.eup %536 }
 0x1a1   :  { %v153_v2 = vmul.f32 %v537_v1, %v151_v63 }
 0x1a3   :  { %v154_v3 = vmul.f32 %v537_v1, %v153_v2  ;;  %v267_v2 = vld [vmem:[%s799_s2] sm:$0xff] }
 0x1a4   :  { %304 = vmatpush.msra.mxu0 %v267_v2 }
 0x1a5   :  { %v155_v4 = vmul.f32 0.5, %v154_v3  ;;  %v224_v3 = vlaneseq }
 0x1a7   :  { %v156_v5 = vsub.f32 1.5, %v155_v4  ;;  %v693_v4 = vand.u32 127, %v224_v3 }
 0x1a9   :  { %v157_v6 = vmul.f32 %v537_v1, %v156_v5  ;;  %vm231_vm13 = vcmp.eq.s32.totalorder %v693_v4, 5  ;;  %vm230_vm14 = vcmp.eq.s32.totalorder %v693_v4, 4  ;;  %vm229_vm15 = vcmp.eq.s32.totalorder %v693_v4, 3 }
 0x1aa   :  { %vm228_vm0 = vcmp.eq.s32.totalorder %v693_v4, 2  ;;  %vm227_vm1 = vcmp.eq.s32.totalorder %v693_v4, 1  ;;  %vm226_vm2 = vcmp.eq.s32.totalorder %v693_v4, 0 }
 0x1ab   :  { %v158_v7 = vmul.f32 %v157_v6, %v151_v63 }
 0x1ad   :  { %v160_v9 = vsel %vm159_vm6, %v151_v63, %v158_v7 }
 0x1ae   :  { %v163_v10 = vsel %vm161_vm7, %v162_v8, %v160_v9 }
 0x1af   :  { %v164_v11 = vadd.f32 1e-08, %v163_v10 }
 0x1b1   :  { %538 = vrcp.f32 %v164_v11  ;;  %v176_v15 = vand.u32 2147483648, %v164_v11  ;;  %v174_v17 = vand.u32 2147483647, %v164_v11  ;;  %vm170_vm9 = vweird.f32 %v164_v11 }
 0x1b3   :  { %v177_v19 = vor.u32 1.1754944e-38, %v176_v15  ;;  %vm175_vm11 = vcmp.eq.f32.partialorder %v174_v17, 8.507059e+37  ;;  %v269_v17 = vld [vmem:[%s799_s2 + $0x10] sm:$0xff] }
 0x1b7   :  { %v539_v12 = vpop.eup %538 }
 0x1b8   :  { %v166_v13 = vmul.f32 %v539_v12, %v164_v11  ;;  %vm171_vm8 = vweird.f32 %v539_v12 }
 0x1b9   :  { %vm172_vm10 = vmor %vm170_vm9, %vm171_vm8 }
 0x1ba   :  { %v167_v14 = vsub.f32 1.0, %v166_v13 }
 0x1bc   :  { %v168_v16 = vmul.f32 %v539_v12, %v167_v14 }
 0x1be   :  { %v169_v18 = vadd.f32 %v539_v12, %v168_v16  ;;  %v270_v16 = vld [vmem:[%s799_s2 + $0x18] sm:$0xff] }
 0x1c0   :  { %v173_v20 = vsel %vm172_vm10, %v539_v12, %v169_v18  ;;  %v268_v18 = vld [vmem:[%s799_s2 + $0x8] sm:$0xff] }
 0x1c1   :  { %v178_v21 = vsel %vm175_vm11, %v177_v19, %v173_v20  ;;  %v528_v19 = vld [vmem:[%s799_s2 + $0x68] ss:$0 sm:$0xff] }
 0x1c2   :  { %v180_v22 = vmul.f32 %v178_v21, %v148_v60  ;;  %v179_v23 = vmul.f32 %v178_v21, %v146_v59 }
 0x1c4   :  { %182 = vrot.lane.b32.xlu0 %v180_v22, %s586_s29  ;;  %187 = vrot.lane.b32.xlu2 %v179_v23, %s582_s1 }
 0x1cc   :  { %80 = vrot.lane.b32.xlu2 %v78_v26, %s581_s18  ;;  %v273_v26 = vld [vmem:[%s799_s2 + $0x30] sm:$0xff] }
 0x1cd   :  { %360 = vmatpush.msra.mxu2 %v273_v26 }
 0x1d4   :  { %212 = vrot.lane.b32.xlu2 %v620_v0, %s584_s22 }
 0x21e   :  { %v188_v27 = vpop.permute.xlu2 %187 }
 0x21f   :  { %v190_v28 = vmul.f32 %v188_v27, %v640_v35  ;;  %v272_v27 = vld [vmem:[%s799_s2 + $0x28] sm:$0xff] }
 0x220   :  { %361 = vmatpush.msra.mxu2 %v272_v27 }
 0x221   :  { %192 = vrot.lane.b32.xlu1 %v190_v28, %s581_s18  ;;  %v279_v28 = vld [vmem:[%s799_s2 + $0x60] sm:$0xff] }
 0x222   :  { %385 = vmatpush.msra.mxu3 %v279_v28 }
 0x226   :  { %v81_v40 = vpop.permute.xlu2 %80 }
 0x227   :  { %v83_v43 = vadd.f32 %v81_v40, %v75_v39  ;;  %v277_v39 = vld [vmem:[%s799_s2 + $0x50] sm:$0xff]  ;;  %v276_v40 = vld [vmem:[%s799_s2 + $0x48] sm:$0xff] }
 0x229   :  { %88 = vrot.lane.b32.xlu1 %v86_v30, %s582_s1 }
 0x22e   :  { %v213_v61 = vpop.permute.xlu2 %212 }
 0x231   :  { %207 = vrot.lane.b32.xlu1 %v205_v32, %s581_s18 }
 0x236   :  { %v183_v33 = vpop.permute.xlu0 %182 }
 0x237   :  { %v185_v36 = vmul.f32 %v183_v33, %v633_v31 }
 0x239   :  { %246 = vperm.xlu1 %520, %v144_v56  }
 0x293   :  { %v193_v37 = vpop.permute.xlu1 %192 }
 0x294   :  { %v195_v38 = vsub.f32 %v185_v36, %v193_v37 }
 0x296   :  { %vm196_vm12 = vcmp.lt.f32.partialorder %v195_v38, 0.0  ;;  %v278_v38 = vld [vmem:[%s799_s2 + $0x58] sm:$0xff] }
 0x297   :  { %v197_v42 = vsel %vm196_vm12, -1.0, %v588_v41  ;;  %386 = vmatpush.msra.mxu3 %v278_v38  ;;  %v530_v41 = vld [vmem:[%s799_s2 + $0x6a] ss:$0 sm:$0xff] }
 0x298   :  { %199 = vrot.lane.b32.xlu0 %v197_v42, %s584_s22 }
 0x299   :  { %387 = vmatpush.msra.mxu3 %v277_v39 }
 0x29b   :  { %v89_v45 = vpop.permute.xlu1 %88  ;;  %388 = vmatpush.msra.mxu3 %v276_v40 }
 0x29c   :  { %v91_v46 = vadd.f32 %v89_v45, %v83_v43 }
 0x29e   :  { %v94_v47 = vadd.f32 %v93_v44, %v91_v46  ;;  %v531_v46 = vld [vmem:[%s799_s2 + $0x6b] ss:$0 sm:$0xff] }
 0x2a0   :  { %216 = vrot.lane.b32.xlu0 %v620_v0, %s585_s24  ;;  %234 = vperm.xlu2 %518, %v94_v47  }
 0x2a3   :  { %v208_v49 = vpop.permute.xlu1 %207 }
 0x2a4   :  { %v210_v53 = vadd.f32 %v208_v49, %v204_v51  ;;  %v591_v51 = vmov 5  }
 0x2a8   :  { %521 = vset.pattern.permute.xlu2 %v589_v48 }
 0x2a9   :  { %251 = vperm.xlu2 %521, %v620_v0  }
 0x2ab   :  { %v247_v6 = vpop.permute.xlu1 %246 }
 0x2b1   :  { %522 = vset.pattern.permute.xlu2 %v590_v54 }
 0x2b2   :  { %263 = vperm.xlu2 %522, %v210_v53  }
 0x30a   :  { %v200_v55 = vpop.permute.xlu0 %199 }
 0x30b   :  { %v677_v56 = vmul.f32 %v200_v55, %v179_v23  ;;  %v679_v57 = vmul.f32 %v200_v55, %v180_v22 }
 0x30d   :  { %v221_v58 = vmul.f32 %v677_v56, %v646_v50  ;;  %v222_v59 = vmul.f32 %v679_v57, %v648_v52  ;;  %v215_v62 = vmul.f32 %v213_v61, %v677_v56  ;;  %v271_v50 = vld [vmem:[%s799_s2 + $0x20] sm:$0xff]  ;;  %v235_v52 = vpop.permute.xlu2 %234  ;;  %s593_s2 = smov [#allocation5]  }
 0x30e   :  { %329 = vmatpush.msra.mxu1 %v271_v50  ;;  %v237_v7 = vsel %vm231_vm13, %v235_v52, 0.0 }
 0x30f   :  { %v223_v60 = vadd.f32 %v222_v59, %v221_v58 }
 0x310   :  { %330 = vmatpush.msra.mxu1 %v270_v16 }
 0x311   :  { %240 = vperm.xlu0 %519, %v223_v60  }
 0x312   :  { %v217_v0 = vpop.permute.xlu0 %216  ;;  %331 = vmatpush.msra.mxu1 %v269_v17 }
 0x313   :  { %v219_v63 = vmul.f32 %v217_v0, %v679_v57 }
 0x314   :  { %332 = vmatpush.msra.mxu1 %v268_v18 }
 0x315   :  { %v220_v1 = vadd.f32 %v219_v63, %v215_v62  ;;  %v252_v5 = vpop.permute.xlu2 %251  ;;  %v592_v63 = vmov 1  }
 0x317   :  { %257 = vperm.xlu1 %520, %v220_v1  }
 0x319   :  { %523 = vset.pattern.permute.xlu0 %v591_v51 }
 0x31d   :  { %v264_v13 = vpop.permute.xlu2 %263 }
 0x31f   :  { %524 = vset.pattern.permute.xlu1 %v592_v63 }
 0x383   :  { %v241_v8 = vpop.permute.xlu0 %240 }
 0x384   :  { %v243_v9 = vsel %vm230_vm14, %v241_v8, %v237_v7 }
 0x385   :  { %v249_v10 = vsel %vm229_vm15, %v247_v6, %v243_v9 }
 0x386   :  { %v254_v12 = vsel %vm228_vm0, %v252_v5, %v249_v10 }
 0x389   :  { %v258_v11 = vpop.permute.xlu1 %257 }
 0x38a   :  { %v260_v14 = vsel %vm227_vm1, %v258_v11, %v254_v12 }
 0x38b   :  { %v266_v15 = vsel %vm226_vm2, %v264_v13, %v260_v14 }
 0x38c   :  { %500 = vmatmul.msk.f32.vlgmr.msra.gmra.mxu0 %vm285_vm3, %v266_v15 }
 0x409   :  { %v306_v20 = vpop.f32.mrf.mxu0 }
 0x40a   :  { %v307_v21 = vadd.f32 %v528_v19, %v306_v20 }
 0x40c   :  { %v310_v22 = vmul.f32 0.01, %v307_v21  ;;  %vm309_vm4 = vcmp.ge.f32.partialorder %v307_v21, 0.0 }
 0x40e   :  { %v311_v23 = vsel %vm309_vm4, %v307_v21, %v310_v22 }
 0x40f   :  { %501 = vmatmul.msk.f32.vlgmr.msra.gmra.mxu1 %vm313_vm5, %v311_v23 }
 0x48c   :  { %v334_v30 = vpop.f32.mrf.mxu1 }
 0x48d   :  { %v335_v32 = vadd.f32 %v529_v29, %v334_v30 }
 0x48f   :  { %vm337_vm6 = vcmp.ge.f32.partialorder %v335_v32, 0.0  ;;  %v338_v33 = vmul.f32 0.01, %v335_v32 }
 0x491   :  { %v339_v34 = vsel %vm337_vm6, %v335_v32, %v338_v33 }
 0x492   :  { %v340_v36 = vmul.f32 %v339_v34, %v311_v23 }
 0x494   :  { %v341_v37 = vadd.f32 %v340_v36, %v311_v23 }
 0x496   :  { %502 = vmatmul.msk.f32.vlgmr.msra.gmra.mxu2 %vm313_vm5, %v341_v37 }
 0x519   :  { %v363_v42 = vpop.f32.mrf.mxu2 }
 0x51a   :  { %v364_v43 = vadd.f32 %v530_v41, %v363_v42 }
 0x51c   :  { %v367_v44 = vmul.f32 0.01, %v364_v43  ;;  %vm366_vm7 = vcmp.ge.f32.partialorder %v364_v43, 0.0 }
 0x51e   :  { %v368_v45 = vsel %vm366_vm7, %v364_v43, %v367_v44 }
 0x51f   :  { %503 = vmatmul.msk.f32.vlgmr.msra.gmra.mxu3 %vm313_vm5, %v368_v45 }
 0x5a2   :  { %v390_v47 = vpop.f32.mrf.mxu3 }
 0x5a3   :  { %v391_v49 = vadd.f32 %v531_v46, %v390_v47 }
 0x5a5   :  { %427 = vrot.lane.b32.xlu2 %v391_v49, %s582_s1  ;;  %395 = vrot.lane.b32.xlu1 %v391_v49, %s585_s24  ;;  %s479_s24 = sshll.u32 %s800_s3, 4  ;;  %s480_s24 = int_to_ptr.hbm [resolvable:$true] %s479_s24 }
 0x5a6   :  { %418 = vrot.lane.b32.xlu0 %v391_v49, %s581_s18  ;;  %s477_s18 = sshll.u32 %s593_s2, 4  ;;  %s478_s18 = int_to_ptr.vmem [resolvable:$true] %s477_s18 }
 0x5ad   :  { %404 = vrot.lane.b32.xlu2 %v391_v49, %s583_s21 }
 0x5ae   :  { %414 = vrot.lane.b32.xlu0 %v391_v49, %s586_s29 }
 0x5ff   :  { %v428_v0 = vpop.permute.xlu2 %427 }
 0x600   :  { %v430_v52 = vmul.f32 %v428_v0, %v640_v35 }
 0x607   :  { %v405_v62 = vpop.permute.xlu2 %404 }
 0x617   :  { %v396_v53 = vpop.permute.xlu1 %395 }
 0x618   :  { %v398_v55 = vmul.f32 %v396_v53, %v677_v56  ;;  %v419_v58 = vpop.permute.xlu0 %418  ;;  %v408_v61 = vmul.f32 %v396_v53, %v679_v57 }
 0x619   :  { %v421_v59 = vmul.f32 %v419_v58, %v677_v56  ;;  %v431_v60 = vmul.f32 %v419_v58, %v679_v57  ;;  %v393_v56 = vmul.f32 %v391_v49, %v633_v31 }
 0x61a   :  { %400 = vrot.lane.b32.xlu2 %v398_v55, %s586_s29 }
 0x61b   :  { %433 = vrot.lane.b32.xlu1 %v431_v60, %s582_s1  ;;  %423 = vrot.lane.b32.xlu0 %v421_v59, %s586_s29 }
 0x620   :  { %v415_v50 = vpop.permute.xlu0 %414 }
 0x621   :  { %v417_v3 = vmul.f32 %v415_v50, %v633_v31 }
 0x623   :  { %410 = vrot.lane.b32.xlu1 %v408_v61, %s582_s1  ;;  %438 = vperm.xlu0 %523, %v391_v49  }
 0x62b   :  { %527 = vset.pattern.permute.xlu0 %v590_v54  ;;  %v407_v54 = vmul.f32 %v405_v62, %v640_v35 }
 0x674   :  { %v401_v1 = vpop.permute.xlu2 %400 }
 0x675   :  { %v403_v2 = vadd.f32 %v401_v1, %v393_v56 }
 0x677   :  { %467 = vperm.xlu0 %527, %v403_v2  }
 0x68d   :  { %v434_v57 = vpop.permute.xlu1 %433  ;;  %v424_v5 = vpop.permute.xlu0 %423 }
 0x68e   :  { %v436_v6 = vadd.f32 %v434_v57, %v430_v52  ;;  %v426_v7 = vadd.f32 %v424_v5, %v417_v3 }
 0x690   :  { %444 = vperm.xlu1 %524, %v436_v6   ;;  %450 = vperm.xlu2 %522, %v426_v7  }
 0x695   :  { %v411_v8 = vpop.permute.xlu1 %410  ;;  %v439_v12 = vpop.permute.xlu0 %438 }
 0x696   :  { %v413_v9 = vadd.f32 %v411_v8, %v407_v54  ;;  %v441_v31 = vsel %vm231_vm13, %v439_v12, 0.0 }
 0x698   :  { %525 = vset.pattern.permute.xlu1 %v589_v48  ;;  %526 = vset.pattern.permute.xlu2 %v592_v63 }
 0x699   :  { %455 = vperm.xlu1 %525, %v391_v49   ;;  %461 = vperm.xlu2 %526, %v413_v9  }
 0x6e9   :  { %v468_v16 = vpop.permute.xlu0 %467 }
 0x6ea   :  { %v451_v10 = vpop.permute.xlu2 %450 }
 0x6f3   :  { %v462_v14 = vpop.permute.xlu2 %461 }
 0x702   :  { %v445_v11 = vpop.permute.xlu1 %444 }
 0x703   :  { %v447_v13 = vsel %vm230_vm14, %v445_v11, %v441_v31 }
 0x704   :  { %v453_v48 = vsel %vm229_vm15, %v451_v10, %v447_v13 }
 0x70b   :  { %v456_v35 = vpop.permute.xlu1 %455 }
 0x70c   :  { %v458_v15 = vsel %vm228_vm0, %v456_v35, %v453_v48 }
 0x70d   :  { %v464_v17 = vsel %vm227_vm1, %v462_v14, %v458_v15 }
 0x70e   :  { %v470_v18 = vsel %vm226_vm2, %v468_v16, %v464_v17 }
 0x70f   :  { %471 = vst.msk [vmem:[#allocation5] sm:$0xff] %vm285_vm3, %v470_v18 }
 0x710   :  { %482 = dma.vmem_to_hbm [thread:$0]  %s478_s18, 128, %s480_s24, [#allocation3]  }
 0x711   :  { %578 = dma.done.wait [#allocation3], 128  }
 0x712   :  { %579 = vsyncadd [#allocation3], 4294967168 }
 0x713   :  { %487 = vsyncpa [#allocation3], 1 }
 0x714   :  { %488 = vsyncpa [#allocation4], 1 }

</bundles_post_ra>
